<compile_context>
chip_gen: v7x
topology: tpu7x:2x2x1
jax: 0.10.0
libtpu: 0.0.40
codegen_flags: <defaults>
</compile_context>

<pallas_src>
import math

import jax
import jax.numpy as jnp
from jax.experimental import pallas as pl
from jax.experimental.pallas import tpu as pltpu


def _round_up(x, m):
    return ((x + m - 1) // m) * m


def _best_tile(dim, pref, align):
    """Largest multiple of `align` that divides `dim` and is <= pref."""
    t = max(align, min(pref, dim))
    t -= t % align
    if t <= 0 or dim % align:
        return dim
    while dim % t:
        t -= align
    return t


def _plan_dim(dim, pref, align, max_overhead=0.10):
    """Choose (tile, padded_dim) with padded_dim % tile == 0 and tile as large
    as possible (<= pref, multiple of align) while bounding the zero-padding
    overhead.  Avoids the 128-wide streamed-tile cliff for awkward sizes
    without blowing up the streamed HBM bytes."""
    dim = max(int(dim), 1)
    hi = min(_round_up(pref, align), _round_up(dim, align))
    allow = max(int(max_overhead * dim), align - 1)
    t = hi
    while t >= align:
        padded = _round_up(dim, t)
        if padded - dim <= allow:
            return t, padded
        t -= align
    return align, _round_up(dim, align)


def _plan_rows(dim, pref, align=8):
    """Row (parallel / megacore) axis: like _plan_dim but guarantee >= 2 row
    tiles where possible so both v7x TensorCores get work."""
    tm, padded = _plan_dim(dim, pref, align)
    if padded // tm < 2 and dim >= 2 * align:
        tm = _round_up(-(-padded // 2), align)
        padded = _round_up(padded, tm)
    return tm, padded


def _pad2d(x, rows, cols, dtype):
    # No-op (no extra HBM copy) when x is already stored padded in the
    # streamed dtype -- callers reusing adj across layers should store it so.
    if x.dtype != dtype:
        x = x.astype(dtype)
    r, c = x.shape
    if r == rows and c == cols:
        return x
    return jnp.zeros((rows, cols), dtype).at[:r, :c].set(x)


def _vmem_budget_bytes():
    cap = 64 * 1024 * 1024  # conservative fallback (v7x per-TC physical VMEM)
    try:
        info = pltpu.get_tpu_info()
        cap = int(getattr(info, "vmem_capacity_bytes", cap))
    except Exception:
        pass
    # ~25% headroom for compiler-internal scratch:
    #   v5e/v6e (128 MiB) -> 96 MiB budget, v7x (64 MiB) -> 48 MiB budget.
    return max(32 * 1024 * 1024, min((cap * 3) // 4, 112 * 1024 * 1024))


def _make_matmul_kernel(*, resident_b, has_bias, tk, precision):
    """out = a @ b (+ bias), K-reduction on grid axis 1, f32 accumulator."""

    def kernel(a_ref, b_ref, *rest):
        if has_bias:
            bias_ref, o_ref, acc_ref = rest
        else:
            o_ref, acc_ref = rest
        kk = pl.program_id(1)

        @pl.when(kk == 0)
        def _():
            acc_ref[...] = jnp.zeros_like(acc_ref)

        if resident_b:
            # b stays fully resident in VMEM (DMA'd from HBM once); slice the
            # current K window instead of re-streaming b per row tile.
            start = pl.multiple_of(kk * tk, 128)
            b_blk = b_ref[pl.ds(start, tk), :]
        else:
            b_blk = b_ref[...]

        acc_ref[...] += jnp.dot(a_ref[...], b_blk,
                                preferred_element_type=jnp.float32,
                                precision=precision)

        @pl.when(kk == pl.num_programs(1) - 1)
        def _():
            res = acc_ref[...]
            if has_bias:
                res = res + bias_ref[...]
            o_ref[...] = res.astype(o_ref.dtype)

    return kernel


def _tiled_matmul(a, b, bias=None, *, out_dtype, block_m=512, block_k=2048,
                  resident_b=None, precision=None):
    """out = a @ b (+ bias).

    a is streamed through pipelined (tm, tk) blocks; the full (lane-dense)
    output width is one block that stays resident as the f32 accumulator.
    b is kept fully VMEM-resident (fetched once) when it fits the budget,
    otherwise streamed per K block.  Tile sizes (never the VMEM limit) are
    clamped so the footprint fits the per-generation VMEM budget."""
    m, k = a.shape
    k2, n = b.shape
    assert k == k2, (a.shape, b.shape)

    a_itm = jnp.dtype(a.dtype).itemsize
    b_itm = jnp.dtype(b.dtype).itemsize
    o_itm = jnp.dtype(out_dtype).itemsize
    bias_bytes = n * 4 if bias is not None else 0

    budget = _vmem_budget_bytes()
    tm = _best_tile(m, block_m, 8)       # sublane-aligned row tile
    tk = _best_tile(k, block_k, 128)     # lane-aligned contraction tile

    def footprint(tm_, tk_, res_):
        b_rows = k if res_ else tk_
        return (2 * tm_ * tk_ * a_itm        # double-buffered a tiles
                + 2 * b_rows * n * b_itm     # b buffers (counted 2x, safe)
                + 2 * tm_ * n * o_itm        # double-buffered output tiles
                + tm_ * n * 4                # f32 accumulator scratch
                + 2 * bias_bytes)

    if resident_b is None:
        # Resident b must leave room for large streamed `a` tiles.
        resident_b = 2 * k * n * b_itm <= budget // 2

    while footprint(tm, tk, resident_b) > budget:
        if resident_b and footprint(8, 128, True) > budget:
            resident_b = False           # resident b itself is too large
            continue
        if tk > 128:
            tk = _best_tile(k, tk // 2, 128)
        elif tm > 8:
            tm = _best_tile(m, tm // 2, 8)
        else:
            break

    need = footprint(tm, tk, resident_b)
    vmem_limit = max(32 << 20, need + (8 << 20))     # needed + headroom
    vmem_limit = min(vmem_limit, budget)             # stay inside budget...
    vmem_limit = max(vmem_limit, need + (1 << 20))   # ...but never below need
    vmem_limit = int(min(vmem_limit, 127 << 20))

    grid = (m // tm, k // tk)

    cost = pl.CostEstimate(
        flops=2 * m * k * n,
        transcendentals=0,
        bytes_accessed=(m * k * a_itm
                        + (1 if resident_b else grid[0]) * k * n * b_itm
                        + m * n * o_itm + bias_bytes),
    )

    a_spec = pl.BlockSpec((tm, tk), lambda i, kk: (i, kk))
    if resident_b:
        b_spec = pl.BlockSpec((k, n), lambda i, kk: (0, 0))
    else:
        b_spec = pl.BlockSpec((tk, n), lambda i, kk: (kk, 0))
    out_spec = pl.BlockSpec((tm, n), lambda i, kk: (i, 0))

    kernel = _make_matmul_kernel(resident_b=resident_b,
                                 has_bias=bias is not None,
                                 tk=tk, precision=precision)

    if bias is not None:
        bias2d = bias.reshape(1, n).astype(jnp.float32)
        in_specs = [a_spec, b_spec, pl.BlockSpec((1, n), lambda i, kk: (0, 0))]
        args = (a, b, bias2d)
    else:
        in_specs = [a_spec, b_spec]
        args = (a, b)

    return pl.pallas_call(
        kernel,
        out_shape=jax.ShapeDtypeStruct((m, n), out_dtype),
        grid_spec=pltpu.PrefetchScalarGridSpec(
            num_scalar_prefetch=0,
            grid=grid,
            in_specs=in_specs,
            out_specs=out_spec,
            scratch_shapes=[pltpu.VMEM((tm, n), jnp.float32)],
        ),
        compiler_params=pltpu.CompilerParams(
            dimension_semantics=("parallel", "arbitrary"),
            vmem_limit_bytes=vmem_limit,
        ),
        cost_estimate=cost,
    )(*args)


def graph_convolution(x, adj, weight, bias=None, *, compute_dtype=None,
                      block_m=512, block_k=2048, precision=None,
                      allow_resident_support=True):
    """Pallas GCN layer: adj @ (x @ weight) + bias  (GraphConvolution.forward).

    x:      [N, in_features]
    adj:    [N, N] dense (row-normalized) adjacency
    weight: [in_features, out_features]
    bias:   [out_features] or None
    compute_dtype: e.g. jnp.bfloat16 halves streamed adj HBM bytes
                   (accumulation is always f32).
    precision: forwarded to jnp.dot (jax.lax.Precision.HIGHEST for strict f32).
    returns [N, out_features] in x.dtype
    """
    n, in_f = x.shape
    assert adj.shape == (n, n)
    in_f2, out_f = weight.shape
    assert in_f == in_f2
    out_dtype = x.dtype
    cdt = compute_dtype or x.dtype

    # Plan tiles and padding together so the dominant adj stream never drops
    # to 128-wide tiles and never over-pads by more than ~10%.
    out_fp = _round_up(out_f, 128)
    in_fp = _round_up(in_f, 128)
    tk2, k_pp = _plan_dim(n, block_k, 128)   # adj columns == support rows
    tm2, m_pp = _plan_rows(n, block_m, 8)    # adj rows (>=2 tiles for megacore)

    x_p = _pad2d(x, k_pp, in_fp, cdt)
    w_p = _pad2d(weight, in_fp, out_fp, cdt)
    adj_p = _pad2d(adj, m_pp, k_pp, cdt)     # no-op if adj pre-padded/pre-cast
    bias_p = None
    if bias is not None:
        bias_p = jnp.zeros((out_fp,), jnp.float32).at[:out_f].set(
            bias.astype(jnp.float32))

    # Stage 1: support = X @ W, computed once, kept lane-dense for stage 2.
    support = _tiled_matmul(x_p, w_p, out_dtype=cdt,
                            block_m=block_m, block_k=block_k,
                            precision=precision)

    # Stage 2 (dominant, HBM-bound): out = adj @ support (+ bias).
    # adj is streamed; support stays VMEM-resident when it fits.
    out_p = _tiled_matmul(adj_p, support, bias_p, out_dtype=out_dtype,
                          block_m=tm2, block_k=tk2,
                          resident_b=(None if allow_resident_support else False),
                          precision=precision)

    return out_p[:n, :out_f]


if __name__ == "__main__":
    # Small synthetic problem: N=256 nodes, in_features=32, out_features=16.
    N, IN_F, OUT_F = 256, 32, 16

    key = jax.random.PRNGKey(0)
    k_x, k_adj, k_w, k_b = jax.random.split(key, 4)

    # Deterministic init mirroring reset_parameters(): U(-stdv, stdv),
    # stdv = 1/sqrt(out_features)
    stdv = 1.0 / math.sqrt(OUT_F)
    weight = jax.random.uniform(k_w, (IN_F, OUT_F), dtype=jnp.float32,
                                minval=-stdv, maxval=stdv)
    bias = jax.random.uniform(k_b, (OUT_F,), dtype=jnp.float32,
                              minval=-stdv, maxval=stdv)

    # Node features and a row-normalized dense "adjacency" with self-loops.
    x = jax.random.normal(k_x, (N, IN_F), dtype=jnp.float32)
    adj_raw = (jax.random.uniform(k_adj, (N, N)) < 0.1).astype(jnp.float32)
    adj_raw = adj_raw + jnp.eye(N, dtype=jnp.float32)
    adj = adj_raw / jnp.sum(adj_raw, axis=1, keepdims=True)

    ref_nobias = adj @ (x @ weight)
    ref = ref_nobias + bias[None, :]

    # f32 path with bias, VMEM-resident support (default planner tiles).
    out = jax.block_until_ready(graph_convolution(x, adj, weight, bias))
    assert out.shape == (N, OUT_F)
    assert jnp.allclose(out, ref, atol=2e-3, rtol=2e-3), "f32 mismatch vs reference"

    # No-bias variant, forcing the streamed-support kernel path.
    out_nb = jax.block_until_ready(
        graph_convolution(x, adj, weight, None, allow_resident_support=False))
    assert jnp.allclose(out_nb, ref_nobias, atol=2e-3, rtol=2e-3), \
        "no-bias/streamed mismatch vs reference"

    # bf16-streamed variant (halves adj HBM traffic; f32 accumulation).
    out_bf16 = jax.block_until_ready(
        graph_convolution(x, adj, weight, bias, compute_dtype=jnp.bfloat16))
    assert jnp.allclose(out_bf16, ref, atol=5e-2, rtol=5e-2), \
        "bf16 mismatch vs reference"

    print("KERNEL_OK")
</pallas_src>

<mosaic_0001>
module attributes {stable_mosaic.version = 11 : i64} {
  func.func @kernel(%arg0: i32, %arg1: i32, %arg2: memref<256x128xf32, #tpu.memory_space<vmem>>, %arg3: memref<128x128xf32, #tpu.memory_space<vmem>>, %arg4: memref<256x128xf32, #tpu.memory_space<vmem>>, %arg5: memref<256x128xf32, #tpu.memory_space<vmem>>) attributes {dimension_semantics = [#tpu.dimension_semantics<parallel>, #tpu.dimension_semantics<arbitrary>], iteration_bounds = array<i64: 1, 1>, scalar_prefetch = 0 : i64, scratch_operands = 1 : i64, tpu.core_type = #tpu.core_type<tc>, window_params = [{transform_indices = @transform_0, window_bounds = array<i64: 256, 128>}, {pipeline_mode = #tpu.pipeline_mode<synchronous>, transform_indices = @transform_1, window_bounds = array<i64: 128, 128>}, {transform_indices = @transform_2, window_bounds = array<i64: 256, 128>}]} {
    %c0_i32 = arith.constant 0 : i32
    %0 = arith.cmpi eq, %arg1, %c0_i32 : i32
    %1 = arith.extui %0 : i1 to i32
    %c0_i32_0 = arith.constant 0 : i32
    %2 = arith.cmpi ne, %1, %c0_i32_0 : i32
    scf.if %2 {
      %cst_9 = arith.constant 0.000000e+00 : f32
      %15 = vector.broadcast %cst_9 : f32 to vector<256x128xf32>
      %c0_10 = arith.constant 0 : index
      %c0_11 = arith.constant 0 : index
      %16 = vector.load %arg5[%c0_10, %c0_11] : memref<256x128xf32, #tpu.memory_space<vmem>>, vector<256x128xf32>
      tpu.vector_store %arg5[%c0_10, %c0_11], %15 {strides = array<i32>} : memref<256x128xf32, #tpu.memory_space<vmem>>, vector<256x128xf32>,
    } else {
    }
    %c128_i32 = arith.constant 128 : i32
    %3 = arith.muli %arg1, %c128_i32 : i32
    %4 = tpu.assume_multiple %3, 128 : i32
    %5 = arith.index_cast %4 : i32 to index
    %c0 = arith.constant 0 : index
    %6 = vector.load %arg3[%5, %c0] : memref<128x128xf32, #tpu.memory_space<vmem>>, vector<128x128xf32>
    %c0_1 = arith.constant 0 : index
    %c0_2 = arith.constant 0 : index
    %7 = vector.load %arg5[%c0_1, %c0_2] : memref<256x128xf32, #tpu.memory_space<vmem>>, vector<256x128xf32>
    %c0_3 = arith.constant 0 : index
    %c0_4 = arith.constant 0 : index
    %8 = vector.load %arg2[%c0_3, %c0_4] : memref<256x128xf32, #tpu.memory_space<vmem>>, vector<256x128xf32>
    %cst = arith.constant dense<0.000000e+00> : vector<256x128xf32>
    %9 = tpu.matmul %8, %6, %cst {dimension_numbers = #tpu.dot_dimension_numbers<[1], [0], [0], [1], [0, 0, 1, 1], [], []>} : vector<256x128xf32>, vector<128x128xf32>, vector<256x128xf32> -> vector<256x128xf32>
    %10 = arith.addf %7, %9 : vector<256x128xf32>
    %c0_5 = arith.constant 0 : index
    %c0_6 = arith.constant 0 : index
    %11 = vector.load %arg5[%c0_5, %c0_6] : memref<256x128xf32, #tpu.memory_space<vmem>>, vector<256x128xf32>
    tpu.vector_store %arg5[%c0_5, %c0_6], %10 {strides = array<i32>} : memref<256x128xf32, #tpu.memory_space<vmem>>, vector<256x128xf32>,
    %c0_i32_7 = arith.constant 0 : i32
    %12 = arith.cmpi eq, %arg1, %c0_i32_7 : i32
    %13 = arith.extui %12 : i1 to i32
    %c0_i32_8 = arith.constant 0 : i32
    %14 = arith.cmpi ne, %13, %c0_i32_8 : i32
    scf.if %14 {
      %c0_9 = arith.constant 0 : index
      %c0_10 = arith.constant 0 : index
      %15 = vector.load %arg5[%c0_9, %c0_10] : memref<256x128xf32, #tpu.memory_space<vmem>>, vector<256x128xf32>
      %c0_11 = arith.constant 0 : index
      %c0_12 = arith.constant 0 : index
      %16 = vector.load %arg4[%c0_11, %c0_12] : memref<256x128xf32, #tpu.memory_space<vmem>>, vector<256x128xf32>
      tpu.vector_store %arg4[%c0_11, %c0_12], %15 {strides = array<i32>} : memref<256x128xf32, #tpu.memory_space<vmem>>, vector<256x128xf32>,
    } else {
    }
    return
  }
  func.func @transform_0(%arg0: i32, %arg1: i32) -> (i32, i32) {
    %c0_i32 = arith.constant 0 : i32
    return %arg0, %arg1 : i32, i32
  }
  func.func @transform_1(%arg0: i32, %arg1: i32) -> (i32, i32) {
    %c0_i32 = arith.constant 0 : i32
    %c0_i32_0 = arith.constant 0 : i32
    %c0_i32_1 = arith.constant 0 : i32
    return %c0_i32, %c0_i32_0 : i32, i32
  }
  func.func @transform_2(%arg0: i32, %arg1: i32) -> (i32, i32) {
    %c0_i32 = arith.constant 0 : i32
    %c0_i32_0 = arith.constant 0 : i32
    return %arg0, %c0_i32 : i32, i32
  }
}

</mosaic_0001>

<bundles_post_ra>
// kernel: tpu_custom_call.1
= control target key start
LH: loop header
LB: loop body
LE: loop exit
PB: predicated region body
PF: predicated region fallthrough
CT: control target
= control target key end

     0   :  { %7 = vsyncpa [#allocation4], 0  ;;  %s850_s0 = inlined_call_operand.hbm [shape: f32[256,128], index: 0, kind: input, shape index: {}]   ;;  %s851_s1 = inlined_call_operand.hbm [shape: f32[128,128], index: 1, kind: input, shape index: {}]   ;;  %s852_s2 = inlined_call_operand.hbm [shape: f32[256,128], index: 2, kind: output, shape index: {}]  }
   0x1   :  { %8 = vsyncpa [#allocation7], 0 }
   0x2   :  { %9 = vsyncpa [#allocation5], 0  ;;  %s785_s9 = smov [#allocation3]   ;;  %s713_s13 = scalar_lea.hbm %s850_s0, 4096 }
   0x3   :  { %s15_s10 = sshll.u32 %s785_s9, 4  ;;  %p714_p0 = scmp.ne.s32.totalorder %s850_s0, %s713_s13  ;;  %s16_s10 = int_to_ptr.vmem [resolvable:$true] %s15_s10 }
   0x4   :  { %p717_p1 = scmp.lt.u32.totalorder %s713_s13, %s850_s0 }
   0x6   :  { %p719_p2 = pnand %p717_p1, %p714_p0 }
   0x8   :  { %722 = shalt.err (!%p719_p2)
}
   0x9   :  { %s723_s18 = scalar_lea.vmem %s16_s10, 4096  ;;  %p728_p4 = scmp.lt.s32.totalorder %s16_s10, %s16_s10 }
   0xa   :  { %p724_p3 = scmp.ne.s32.totalorder %s16_s10, %s723_s18  ;;  %p729_p5 = scmp.lt.s32.totalorder %s723_s18, %s723_s18 }
   0xc   :  { %p730_p6 = por %p729_p5, %p728_p4 }
   0xe   :  { %p731_p7 = pnand %p730_p6, %p724_p3 }
  0x10   :  { %734 = shalt.err (!%p731_p7)
}
  0x11   :  { %s786_s19 = smov 128   ;;  %s787_s20 = smov 8  }
  0x12   :  { %21 = dma.hbm_to_vmem [thread:$0]  %s850_s0, 4096, %s16_s10, [#allocation4], %s786_s19, %s786_s19, %s787_s20  }
  0x13   :  { %s788_s23 = smov [#allocation6]   ;;  %s735_s27 = scalar_lea.hbm %s851_s1, 2048 }
  0x14   :  { %s27_s24 = sshll.u32 %s788_s23, 4  ;;  %p736_p8 = scmp.ne.s32.totalorder %s851_s1, %s735_s27  ;;  %s28_s24 = int_to_ptr.vmem [resolvable:$true] %s27_s24 }
  0x15   :  { %p739_p9 = scmp.lt.u32.totalorder %s735_s27, %s851_s1 }
  0x17   :  { %p741_p10 = pnand %p739_p9, %p736_p8 }
  0x19   :  { %744 = shalt.err (!%p741_p10)
}
  0x1a   :  { %s745_s4 = scalar_lea.vmem %s28_s24, 2048  ;;  %p750_p12 = scmp.lt.s32.totalorder %s28_s24, %s28_s24 }
  0x1b   :  { %p746_p11 = scmp.ne.s32.totalorder %s28_s24, %s745_s4  ;;  %p751_p13 = scmp.lt.s32.totalorder %s745_s4, %s745_s4 }
  0x1d   :  { %p752_p0 = por %p751_p13, %p750_p12 }
  0x1f   :  { %p753_p1 = pnand %p752_p0, %p746_p11 }
  0x21   :  { %756 = shalt.err (!%p753_p1)
}
  0x22   :  { %33 = dma.hbm_to_vmem [thread:$0]  %s851_s1, 2048, %s28_s24, [#allocation7], %s786_s19, %s786_s19, %s787_s20  }
  0x23   :  { %779 = dma.done.wait [#allocation4], 4096  }
  0x24   :  { %780 = vsyncadd [#allocation4], 4294963200 }
  0x25   :  { %781 = dma.done.wait [#allocation7], 2048  }
  0x26   :  { %782 = vsyncadd [#allocation7], 4294965248  ;;  %v78_v0 = vld [vmem:[#allocation6] sm:$0xff]  ;;  %v79_v1 = vld [vmem:[#allocation6 + $0x8] sm:$0xff]  ;;  %s789_s1 = smov [#allocation8]  }
  0x27   :  { %v80_v2 = vld [vmem:[#allocation6 + $0x10] sm:$0xff]  ;;  %v660_v3 = vpack.c.bf16 %v79_v1, %v78_v0  ;;  %v81_v4 = vld [vmem:[#allocation6 + $0x18] sm:$0xff]  ;;  %v82_v6 = vld [vmem:[#allocation6 + $0x20] sm:$0xff]  ;;  %s519_s6 = sshll.u32 %s789_s1, 4  ;;  %s520_s6 = int_to_ptr.vmem [resolvable:$true] %s519_s6 }
  0x28   :  { %v664_v5 = vpack.c.bf16 %v81_v4, %v80_v2  ;;  %v83_v7 = vld [vmem:[#allocation6 + $0x28] sm:$0xff]  ;;  %v126_v9 = vld [vmem:[#allocation3] sm:$0xff]  ;;  %v84_v11 = vld [vmem:[#allocation6 + $0x30] sm:$0xff]  ;;  %s757_s7 = scalar_lea.vmem %s520_s6, 4096  ;;  %p762_p3 = scmp.lt.s32.totalorder %s520_s6, %s520_s6 }
  0x29   :  { %661 = vmatprep.subr.bf16.mxu0 %v660_v3  ;;  %692 = vmatprep.subr.bf16.mxu1 %v660_v3  ;;  %v668_v8 = vpack.c.bf16 %v83_v7, %v82_v6  ;;  %v142_v10 = vld [vmem:[#allocation3 + $0x80] sm:$0xff]  ;;  %v85_v12 = vld [vmem:[#allocation6 + $0x38] sm:$0xff]  ;;  %v87_v15 = vld [vmem:[#allocation6 + $0x48] sm:$0xff]  ;;  %p758_p2 = scmp.ne.s32.totalorder %s520_s6, %s757_s7  ;;  %p763_p4 = scmp.lt.s32.totalorder %s757_s7, %s757_s7 }
  0x2a   :  { %663 = vmatpush3.bf16.msra.mxu0 %v660_v3  ;;  %700 = vmatpush3.bf16.msra.mxu1 %v660_v3  ;;  %v672_v13 = vpack.c.bf16 %v85_v12, %v84_v11  ;;  %v86_v14 = vld [vmem:[#allocation6 + $0x40] sm:$0xff]  ;;  %v88_v17 = vld [vmem:[#allocation6 + $0x50] sm:$0xff]  ;;  %v89_v18 = vld [vmem:[#allocation6 + $0x58] sm:$0xff] }
  0x2b   :  { %665 = vmatprep.subr.bf16.mxu0 %v664_v5  ;;  %693 = vmatprep.subr.bf16.mxu1 %v664_v5  ;;  %v676_v16 = vpack.c.bf16 %v87_v15, %v86_v14  ;;  %v680_v19 = vpack.c.bf16 %v89_v18, %v88_v17  ;;  %v90_v20 = vld [vmem:[#allocation6 + $0x60] sm:$0xff]  ;;  %v91_v21 = vld [vmem:[#allocation6 + $0x68] sm:$0xff]  ;;  %v92_v23 = vld [vmem:[#allocation6 + $0x70] sm:$0xff]  ;;  %p764_p5 = por %p763_p4, %p762_p3 }
  0x2c   :  { %612 = vmatprep.mubr.f32.mxu0 %v126_v9  ;;  %636 = vmatprep.mubr.f32.mxu1 %v142_v10  ;;  %v684_v22 = vpack.c.bf16 %v91_v21, %v90_v20  ;;  %v93_v24 = vld [vmem:[#allocation6 + $0x78] sm:$0xff]  ;;  %v127_v26 = vld [vmem:[#allocation3 + $0x8] sm:$0xff]  ;;  %v128_v28 = vld [vmem:[#allocation3 + $0x10] sm:$0xff] }
  0x2d   :  { %v688_v25 = vpack.c.bf16 %v93_v24, %v92_v23  ;;  %v143_v27 = vld [vmem:[#allocation3 + $0x88] sm:$0xff]  ;;  %v144_v29 = vld [vmem:[#allocation3 + $0x90] sm:$0xff]  ;;  %v129_v30 = vld [vmem:[#allocation3 + $0x18] sm:$0xff]  ;;  %p765_p6 = pnand %p764_p5, %p758_p2 }
  0x2e   :  { %667 = vmatpush3.bf16.msra.mxu0 %v664_v5  ;;  %701 = vmatpush3.bf16.msra.mxu1 %v664_v5  ;;  %v145_v31 = vld [vmem:[#allocation3 + $0x98] sm:$0xff]  ;;  %v130_v32 = vld [vmem:[#allocation3 + $0x20] sm:$0xff]  ;;  %v131_v34 = vld [vmem:[#allocation3 + $0x28] sm:$0xff] }
  0x2f   :  { %669 = vmatprep.subr.bf16.mxu0 %v668_v8  ;;  %694 = vmatprep.subr.bf16.mxu1 %v668_v8  ;;  %v146_v33 = vld [vmem:[#allocation3 + $0xa0] sm:$0xff]  ;;  %v147_v35 = vld [vmem:[#allocation3 + $0xa8] sm:$0xff]  ;;  %v132_v36 = vld [vmem:[#allocation3 + $0x30] sm:$0xff] }
  0x30   :  { %v148_v37 = vld [vmem:[#allocation3 + $0xb0] sm:$0xff]  ;;  %v133_v38 = vld [vmem:[#allocation3 + $0x38] sm:$0xff]  ;;  %v134_v40 = vld [vmem:[#allocation3 + $0x40] sm:$0xff] }
  0x31   :  { %v149_v39 = vld [vmem:[#allocation3 + $0xb8] sm:$0xff]  ;;  %v150_v41 = vld [vmem:[#allocation3 + $0xc0] sm:$0xff]  ;;  %v135_v42 = vld [vmem:[#allocation3 + $0x48] sm:$0xff] }
  0x32   :  { %671 = vmatpush3.bf16.msra.mxu0 %v668_v8  ;;  %702 = vmatpush3.bf16.msra.mxu1 %v668_v8  ;;  %v151_v43 = vld [vmem:[#allocation3 + $0xc8] sm:$0xff]  ;;  %v136_v44 = vld [vmem:[#allocation3 + $0x50] sm:$0xff]  ;;  %v137_v46 = vld [vmem:[#allocation3 + $0x58] sm:$0xff] }
  0x33   :  { %673 = vmatprep.subr.bf16.mxu0 %v672_v13  ;;  %695 = vmatprep.subr.bf16.mxu1 %v672_v13  ;;  %v152_v45 = vld [vmem:[#allocation3 + $0xd0] sm:$0xff]  ;;  %v153_v47 = vld [vmem:[#allocation3 + $0xd8] sm:$0xff]  ;;  %v138_v48 = vld [vmem:[#allocation3 + $0x60] sm:$0xff] }
  0x34   :  { %v154_v49 = vld [vmem:[#allocation3 + $0xe0] sm:$0xff]  ;;  %v139_v50 = vld [vmem:[#allocation3 + $0x68] sm:$0xff]  ;;  %v140_v52 = vld [vmem:[#allocation3 + $0x70] sm:$0xff] }
  0x35   :  { %v155_v51 = vld [vmem:[#allocation3 + $0xe8] sm:$0xff]  ;;  %v156_v53 = vld [vmem:[#allocation3 + $0xf0] sm:$0xff]  ;;  %v141_v54 = vld [vmem:[#allocation3 + $0x78] sm:$0xff] }
  0x36   :  { %675 = vmatpush3.bf16.msra.mxu0 %v672_v13  ;;  %703 = vmatpush3.bf16.msra.mxu1 %v672_v13  ;;  %v157_v55 = vld [vmem:[#allocation3 + $0xf8] sm:$0xff] }
  0x37   :  { %677 = vmatprep.subr.bf16.mxu0 %v676_v16  ;;  %696 = vmatprep.subr.bf16.mxu1 %v676_v16 }
  0x3a   :  { %679 = vmatpush3.bf16.msra.mxu0 %v676_v16  ;;  %704 = vmatpush3.bf16.msra.mxu1 %v676_v16 }
  0x3b   :  { %681 = vmatprep.subr.bf16.mxu0 %v680_v19  ;;  %697 = vmatprep.subr.bf16.mxu1 %v680_v19 }
  0x3e   :  { %683 = vmatpush3.bf16.msra.mxu0 %v680_v19  ;;  %705 = vmatpush3.bf16.msra.mxu1 %v680_v19 }
  0x3f   :  { %685 = vmatprep.subr.bf16.mxu0 %v684_v22  ;;  %698 = vmatprep.subr.bf16.mxu1 %v684_v22 }
  0x42   :  { %687 = vmatpush3.bf16.msra.mxu0 %v684_v22  ;;  %706 = vmatpush3.bf16.msra.mxu1 %v684_v22 }
  0x43   :  { %689 = vmatprep.subr.bf16.mxu0 %v688_v25  ;;  %699 = vmatprep.subr.bf16.mxu1 %v688_v25 }
  0x46   :  { %691 = vmatpush3.bf16.msra.mxu0 %v688_v25  ;;  %707 = vmatpush3.bf16.msra.mxu1 %v688_v25 }
  0x49   :  { %613 = vmatmul.mubr.f32.vlgmr.msra.gmra.mrb[0].mxu0 %v127_v26  ;;  %637 = vmatmul.mubr.f32.vlgmr.msra.gmra.mrb[0].mxu1 %v143_v27 }
  0x4a   :  { %615 = vmatprep.mubr.f32.mxu0 %v128_v28  ;;  %639 = vmatprep.mubr.f32.mxu1 %v144_v29 }
  0x4d   :  { %616 = vmatmul.mubr.f32.gmra.mrb[2].mxu0 %v129_v30  ;;  %640 = vmatmul.mubr.f32.gmra.mrb[2].mxu1 %v145_v31 }
  0x4e   :  { %618 = vmatprep.mubr.f32.mxu0 %v130_v32  ;;  %642 = vmatprep.mubr.f32.mxu1 %v146_v33 }
  0x51   :  { %619 = vmatmul.mubr.f32.gmra.mrb[4].mxu0 %v131_v34  ;;  %643 = vmatmul.mubr.f32.gmra.mrb[4].mxu1 %v147_v35 }
  0x52   :  { %621 = vmatprep.mubr.f32.mxu0 %v132_v36  ;;  %645 = vmatprep.mubr.f32.mxu1 %v148_v37 }
  0x55   :  { %622 = vmatmul.mubr.f32.gmra.mrb[6].mxu0 %v133_v38  ;;  %646 = vmatmul.mubr.f32.gmra.mrb[6].mxu1 %v149_v39 }
  0x56   :  { %624 = vmatprep.mubr.f32.mxu0 %v134_v40  ;;  %648 = vmatprep.mubr.f32.mxu1 %v150_v41 }
  0x59   :  { %625 = vmatmul.mubr.f32.gmra.mrb[8].mxu0 %v135_v42  ;;  %649 = vmatmul.mubr.f32.gmra.mrb[8].mxu1 %v151_v43 }
  0x5a   :  { %627 = vmatprep.mubr.f32.mxu0 %v136_v44  ;;  %651 = vmatprep.mubr.f32.mxu1 %v152_v45 }
  0x5d   :  { %628 = vmatmul.mubr.f32.gmra.mrb[10].mxu0 %v137_v46  ;;  %652 = vmatmul.mubr.f32.gmra.mrb[10].mxu1 %v153_v47 }
  0x5e   :  { %630 = vmatprep.mubr.f32.mxu0 %v138_v48  ;;  %654 = vmatprep.mubr.f32.mxu1 %v154_v49 }
  0x61   :  { %631 = vmatmul.mubr.f32.gmra.mrb[12].mxu0 %v139_v50  ;;  %655 = vmatmul.mubr.f32.gmra.mrb[12].mxu1 %v155_v51 }
  0x62   :  { %633 = vmatprep.mubr.f32.mxu0 %v140_v52  ;;  %657 = vmatprep.mubr.f32.mxu1 %v156_v53 }
  0x65   :  { %634 = vmatmul.mubr.f32.gmra.mrb[14].mxu0 %v141_v54  ;;  %658 = vmatmul.mubr.f32.gmra.mrb[14].mxu1 %v157_v55 }
 0x11c   :  { %v614_v56 = vpop.f32.mrb[0].mxu0  ;;  %v638_v57 = vpop.f32.mrb[0].mxu1 }
 0x11d   :  { %483 = vst [vmem:[#allocation8 + $0x8] sm:$0xff] %v614_v56  ;;  %499 = vst [vmem:[#allocation8 + $0x88] sm:$0xff] %v638_v57  ;;  %v224_v58 = vpop.f32.mrb[1].mxu0  ;;  %v304_v59 = vpop.f32.mrb[1].mxu1 }
 0x11e   :  { %482 = vst [vmem:[#allocation8] sm:$0xff] %v224_v58  ;;  %498 = vst [vmem:[#allocation8 + $0x80] sm:$0xff] %v304_v59 }
 0x120   :  { %v617_v60 = vpop.f32.mrb[2].mxu0  ;;  %v641_v61 = vpop.f32.mrb[2].mxu1 }
 0x121   :  { %485 = vst [vmem:[#allocation8 + $0x18] sm:$0xff] %v617_v60  ;;  %501 = vst [vmem:[#allocation8 + $0x98] sm:$0xff] %v641_v61  ;;  %v234_v62 = vpop.f32.mrb[3].mxu0  ;;  %v314_v63 = vpop.f32.mrb[3].mxu1 }
 0x122   :  { %484 = vst [vmem:[#allocation8 + $0x10] sm:$0xff] %v234_v62  ;;  %500 = vst [vmem:[#allocation8 + $0x90] sm:$0xff] %v314_v63 }
 0x124   :  { %v620_v0 = vpop.f32.mrb[4].mxu0  ;;  %v644_v1 = vpop.f32.mrb[4].mxu1 }
 0x125   :  { %487 = vst [vmem:[#allocation8 + $0x28] sm:$0xff] %v620_v0  ;;  %503 = vst [vmem:[#allocation8 + $0xa8] sm:$0xff] %v644_v1  ;;  %v244_v2 = vpop.f32.mrb[5].mxu0  ;;  %v324_v3 = vpop.f32.mrb[5].mxu1 }
 0x126   :  { %486 = vst [vmem:[#allocation8 + $0x20] sm:$0xff] %v244_v2  ;;  %502 = vst [vmem:[#allocation8 + $0xa0] sm:$0xff] %v324_v3 }
 0x128   :  { %v623_v4 = vpop.f32.mrb[6].mxu0  ;;  %v647_v5 = vpop.f32.mrb[6].mxu1 }
 0x129   :  { %489 = vst [vmem:[#allocation8 + $0x38] sm:$0xff] %v623_v4  ;;  %505 = vst [vmem:[#allocation8 + $0xb8] sm:$0xff] %v647_v5  ;;  %v254_v6 = vpop.f32.mrb[7].mxu0  ;;  %v334_v7 = vpop.f32.mrb[7].mxu1 }
 0x12a   :  { %488 = vst [vmem:[#allocation8 + $0x30] sm:$0xff] %v254_v6  ;;  %504 = vst [vmem:[#allocation8 + $0xb0] sm:$0xff] %v334_v7 }
 0x12c   :  { %v626_v8 = vpop.f32.mrb[8].mxu0  ;;  %v650_v9 = vpop.f32.mrb[8].mxu1 }
 0x12d   :  { %491 = vst [vmem:[#allocation8 + $0x48] sm:$0xff] %v626_v8  ;;  %507 = vst [vmem:[#allocation8 + $0xc8] sm:$0xff] %v650_v9  ;;  %v264_v10 = vpop.f32.mrb[9].mxu0  ;;  %v344_v11 = vpop.f32.mrb[9].mxu1 }
 0x12e   :  { %490 = vst [vmem:[#allocation8 + $0x40] sm:$0xff] %v264_v10  ;;  %506 = vst [vmem:[#allocation8 + $0xc0] sm:$0xff] %v344_v11 }
 0x130   :  { %v629_v12 = vpop.f32.mrb[10].mxu0  ;;  %v653_v13 = vpop.f32.mrb[10].mxu1 }
 0x131   :  { %493 = vst [vmem:[#allocation8 + $0x58] sm:$0xff] %v629_v12  ;;  %509 = vst [vmem:[#allocation8 + $0xd8] sm:$0xff] %v653_v13  ;;  %v274_v14 = vpop.f32.mrb[11].mxu0  ;;  %v354_v15 = vpop.f32.mrb[11].mxu1 }
 0x132   :  { %492 = vst [vmem:[#allocation8 + $0x50] sm:$0xff] %v274_v14  ;;  %508 = vst [vmem:[#allocation8 + $0xd0] sm:$0xff] %v354_v15 }
 0x134   :  { %v632_v16 = vpop.f32.mrb[12].mxu0  ;;  %v656_v17 = vpop.f32.mrb[12].mxu1 }
 0x135   :  { %495 = vst [vmem:[#allocation8 + $0x68] sm:$0xff] %v632_v16  ;;  %511 = vst [vmem:[#allocation8 + $0xe8] sm:$0xff] %v656_v17  ;;  %v284_v18 = vpop.f32.mrb[13].mxu0  ;;  %v364_v19 = vpop.f32.mrb[13].mxu1 }
 0x136   :  { %494 = vst [vmem:[#allocation8 + $0x60] sm:$0xff] %v284_v18  ;;  %510 = vst [vmem:[#allocation8 + $0xe0] sm:$0xff] %v364_v19 }
 0x138   :  { %v635_v20 = vpop.f32.mrb[14].mxu0  ;;  %v659_v21 = vpop.f32.mrb[14].mxu1 }
 0x139   :  { %497 = vst [vmem:[#allocation8 + $0x78] sm:$0xff] %v635_v20  ;;  %513 = vst [vmem:[#allocation8 + $0xf8] sm:$0xff] %v659_v21  ;;  %v294_v22 = vpop.f32.mrb[15].mxu0  ;;  %v374_v23 = vpop.f32.mrb[15].mxu1 }
 0x13a   :  { %496 = vst [vmem:[#allocation8 + $0x70] sm:$0xff] %v294_v22  ;;  %512 = vst [vmem:[#allocation8 + $0xf0] sm:$0xff] %v374_v23 }
 0x13b   :  { %768 = shalt.err (!%p765_p6)
}
 0x13c   :  { %s769_s10 = scalar_lea.hbm %s852_s2, 4096 }
 0x13d   :  { %p770_p7 = scmp.ne.s32.totalorder %s852_s2, %s769_s10  ;;  %p773_p8 = scmp.lt.u32.totalorder %s769_s10, %s852_s2 }
 0x13f   :  { %p775_p9 = pnand %p773_p8, %p770_p7 }
 0x141   :  { %778 = shalt.err (!%p775_p9)
}
 0x142   :  { %525 = dma.vmem_to_hbm [thread:$0]  %s520_s6, 4096, %s852_s2, [#allocation5], %s786_s19, %s786_s19, %s787_s20  }
 0x143   :  { %783 = dma.done.wait [#allocation5], 4096  }
 0x144   :  { %784 = vsyncadd [#allocation5], 4294963200 }
 0x145   :  { %529 = vsyncpa [#allocation4], 1 }
 0x146   :  { %530 = vsyncpa [#allocation7], 1 }
 0x147   :  { %531 = vsyncpa [#allocation5], 1 }

</bundles_post_ra>
